<compile_context>
chip_gen: v6e
topology: v6e:2x2x1
jax: 0.10.0
libtpu: 0.0.40
codegen_flags: <defaults>
</compile_context>

<pallas_src>
import functools
import math

import jax
import jax.numpy as jnp
from jax import lax
from jax.experimental import pallas as pl
from jax.experimental.pallas import tpu as pltpu


def _erf(x):
    # Abramowitz & Stegun 7.1.26 rational approximation, |err| < 1.5e-7.
    # Uses only ops guaranteed to lower on the TPU VPU/EUP.
    a1, a2, a3, a4, a5 = (0.254829592, -0.284496736, 1.421413741,
                          -1.453152027, 1.061405429)
    p = 0.3275911
    ax = jnp.abs(x)
    # NOTE(v5e): this divide could be routed through pl.reciprocal(approx=True)
    # (EUP) if the VALU becomes the saturating unit; kept exact for accuracy.
    t = 1.0 / (1.0 + p * ax)
    poly = ((((a5 * t + a4) * t + a3) * t + a2) * t + a1) * t
    y = 1.0 - poly * jnp.exp(-ax * ax)
    return jnp.where(x >= 0, y, -y)


def _gelu_exact(x):
    # torch.nn.GELU() default = exact erf-based GELU.
    return 0.5 * x * (1.0 + _erf(x * 0.7071067811865475))


# --------------------------------------------------------------------------
# Kernel 1: per-channel batch-norm sums (sum and sum of squares), accumulated
# over the batch grid axis into a resident (C, 1) output block.
# --------------------------------------------------------------------------
def _bn_stats_kernel(x_ref, s1_ref, s2_ref):
    @pl.when(pl.program_id(0) == 0)
    def _():
        s1_ref[...] = jnp.zeros_like(s1_ref)
        s2_ref[...] = jnp.zeros_like(s2_ref)

    x = x_ref[...].astype(jnp.float32)                    # (C, H*W), lane-dense
    s1_ref[...] += jnp.sum(x, axis=1, keepdims=True)      # (C, 1)
    s2_ref[...] += jnp.sum(x * x, axis=1, keepdims=True)  # (C, 1)


# --------------------------------------------------------------------------
# Kernel 2: fused BN-normalize + depthwise 3x3 conv + GELU + 1x1 conv (MXU)
# + SPADE modulation, one (folded) batch element per grid step.
# --------------------------------------------------------------------------
def _spade_kernel(mean_ref, invstd_ref, mask_ref, lp_ref, gg_ref, dww_ref,
                  dwb_ref, pww_ref, pwb_ref, o_ref, *, w, guard):
    C, HW = o_ref.shape

    # ---- BatchNorm2d(affine=False); batch statistics precomputed outside ----
    normalized = (lp_ref[...].astype(jnp.float32) - mean_ref[...]) * invstd_ref[...]

    # Column masks: zero the taps that would wrap horizontally across rows of
    # the flattened plane (they stand in for the conv's zero padding).
    masks = mask_ref[...]                                  # (2, HW) f32
    not_left = masks[0:1, :]                               # 0 where x == 0
    not_right = masks[1:2, :]                              # 0 where x == W-1

    # ---- depthwise 3x3 conv: 9 contiguous shifted slices of the guarded,
    # flattened global features, per-channel tap weights broadcast. ----
    acc = jnp.zeros((C, HW), jnp.float32)
    for i in range(3):
        for j in range(3):
            off = guard + (i - 1) * w + (j - 1)            # static, in-bounds
            win = gg_ref[:, pl.ds(off, HW)].astype(jnp.float32)
            if j == 0:
                win = win * not_left
            elif j == 2:
                win = win * not_right
            acc = acc + dww_ref[i * 3 + j] * win           # (C,1) taps broadcast
    h = _gelu_exact(acc + dwb_ref[...])                    # (C, HW)

    # ---- pointwise 1x1 conv on the MXU: (2C, C) @ (C, HW) ----
    gb = jnp.dot(pww_ref[...], h,
                 precision=jax.lax.Precision.HIGHEST,
                 preferred_element_type=jnp.float32) + pwb_ref[...]   # (2C, HW)

    gamma = gb[:C, :]
    beta = gb[C:, :]
    o_ref[...] = (normalized * (1.0 + gamma) + beta).astype(o_ref.dtype)


# --------------------------------------------------------------------------
# Wrapper
# --------------------------------------------------------------------------
def spade_forward(local_feat, global_feat, dw_w, dw_b, pw_w, pw_b, *, eps=1e-5):
    """SPADE forward. local/global: (N, C, H, W); dw_w: (C,1,3,3); dw_b: (C,);
    pw_w: (2C, C, 1, 1); pw_b: (2C,)."""
    N, C, H, W = local_feat.shape
    C2 = 2 * C
    HW = H * W
    guard = W + 1                      # covers the most-negative / positive tap
    HWG = HW + 2 * guard
    f32 = jnp.float32

    # Fold batch elements into the channel (sublane) dim when C < 8 so vregs
    # use all 8 sublanes and the grid has fewer (fuller) steps.
    fold = 1
    if C < 8:
        want = max(1, 8 // C)
        for cand in range(min(want, N), 0, -1):
            if N % cand == 0:
                fold = cand
                break
    Nf = N // fold
    Cf = fold * C
    Cf2 = 2 * Cf

    # ----- pass 1: per-(folded-)channel sums for BatchNorm batch stats -----
    xflat = local_feat.reshape(Nf, Cf, HW)                 # lane-dense last dim
    s1f, s2f = pl.pallas_call(
        _bn_stats_kernel,
        out_shape=(jax.ShapeDtypeStruct((Cf, 1), f32),
                   jax.ShapeDtypeStruct((Cf, 1), f32)),
        grid=(Nf,),
        in_specs=[pl.BlockSpec((None, Cf, HW), lambda n: (n, 0, 0))],
        out_specs=(pl.BlockSpec((Cf, 1), lambda n: (0, 0)),
                   pl.BlockSpec((Cf, 1), lambda n: (0, 0))),
        compiler_params=pltpu.CompilerParams(
            dimension_semantics=("arbitrary",)),
    )(xflat)

    # Finalize statistics once in XLA (tiny (C,) math) instead of redoing the
    # mean/var/rsqrt on every grid step of kernel 2.
    s1 = jnp.sum(s1f.reshape(fold, C, 1), axis=0)
    s2 = jnp.sum(s2f.reshape(fold, C, 1), axis=0)
    cnt = float(N * HW)
    mean = s1 / cnt                                        # (C, 1)
    # NOTE: E[x^2]-mean^2 can cancel for large-offset inputs; clamp to >= 0.
    var = jnp.maximum(s2 / cnt - mean * mean, 0.0)         # biased variance
    inv_std = lax.rsqrt(var + eps)
    mean_f = jnp.tile(mean, (fold, 1)).astype(f32)         # (Cf, 1)
    inv_std_f = jnp.tile(inv_std, (fold, 1)).astype(f32)   # (Cf, 1)

    # ----- layout prep (pure JAX glue) -----
    # local_feat: unpadded, lane-dense (no extra HBM pass).
    lpf = local_feat.reshape(Nf, Cf, HW)
    # global_feat: flatten and add a (W+1)-zero guard on both sides so every
    # depthwise tap is a contiguous in-bounds slice (vertical zero padding).
    gflat = global_feat.reshape(N, C, HW)
    gg = jnp.pad(gflat, ((0, 0), (0, 0), (guard, guard))).reshape(Nf, Cf, HWG)

    # Column masks for the horizontal zero padding (wrap-around cancel).
    col = jnp.arange(HW, dtype=jnp.int32) % W
    masks = jnp.stack([(col != 0), (col != W - 1)]).astype(f32)   # (2, HW)

    # Depthwise 3x3 weights, tap-major, tiled across the batch fold.
    dww = jnp.transpose(dw_w.reshape(C, 9), (1, 0)).reshape(9, C, 1).astype(f32)
    dww = jnp.tile(dww, (1, fold, 1))                      # (9, Cf, 1)
    dwb = jnp.tile(dw_b.reshape(C, 1).astype(f32), (fold, 1))     # (Cf, 1)

    # Pointwise 1x1 weights, block-diagonal across the batch fold, rows
    # permuted so [0:Cf) are gammas and [Cf:2Cf) are betas.
    pw2 = pw_w.reshape(C2, C).astype(f32)
    eye = jnp.eye(fold, dtype=f32)
    pww = jnp.concatenate([jnp.kron(eye, pw2[:C]), jnp.kron(eye, pw2[C:])],
                          axis=0)                          # (2Cf, Cf)
    pwb = jnp.concatenate([jnp.tile(pw_b[:C].astype(f32), fold),
                           jnp.tile(pw_b[C:].astype(f32), fold)]).reshape(Cf2, 1)

    # ----- VMEM budget from the actual per-step working set -----
    itemsize = jnp.dtype(local_feat.dtype).itemsize
    per_step_io = itemsize * Cf * (HW + HWG + HW)          # lp + gg + out blocks
    weights_b = 4 * (2 * Cf + 2 * HW + 9 * Cf + Cf + Cf2 * Cf + Cf2)
    temps_b = 4 * (6 * Cf * HW + Cf2 * HW)                 # f32 intermediates
    need = 2 * (per_step_io + weights_b) + temps_b         # x2 double-buffering
    try:
        vmem_cap = pltpu.get_tpu_info().vmem_capacity_bytes
    except Exception:
        vmem_cap = 64 * 1024 * 1024
    vmem_limit = int(min(int(0.75 * vmem_cap),
                         max(8 * 1024 * 1024, 2 * need)))

    kernel = functools.partial(_spade_kernel, w=W, guard=guard)

    out_f = pl.pallas_call(
        kernel,
        out_shape=jax.ShapeDtypeStruct((Nf, Cf, HW), local_feat.dtype),
        grid=(Nf,),
        in_specs=[
            pl.BlockSpec((Cf, 1), lambda n: (0, 0)),            # BN mean
            pl.BlockSpec((Cf, 1), lambda n: (0, 0)),            # BN inv_std
            pl.BlockSpec((2, HW), lambda n: (0, 0)),            # column masks
            pl.BlockSpec((None, Cf, HW), lambda n: (n, 0, 0)),  # local feat (unpadded)
            pl.BlockSpec((None, Cf, HWG), lambda n: (n, 0, 0)), # global feat + guard
            pl.BlockSpec((9, Cf, 1), lambda n: (0, 0, 0)),      # depthwise taps
            pl.BlockSpec((Cf, 1), lambda n: (0, 0)),            # depthwise bias
            pl.BlockSpec((Cf2, Cf), lambda n: (0, 0)),          # pointwise weight
            pl.BlockSpec((Cf2, 1), lambda n: (0, 0)),           # pointwise bias
        ],
        out_specs=pl.BlockSpec((None, Cf, HW), lambda n: (n, 0, 0)),
        compiler_params=pltpu.CompilerParams(
            dimension_semantics=("parallel",),
            vmem_limit_bytes=vmem_limit),
    )(mean_f, inv_std_f, masks, lpf, gg, dww, dwb, pww, pwb)

    # Pure view reshape (no data movement): unfold batch and spatial dims.
    return out_f.reshape(N, C, H, W)


# --------------------------------------------------------------------------
# Pure-JAX reference mirroring the PyTorch module (train-mode BatchNorm).
# --------------------------------------------------------------------------
def _reference_spade(local_feat, global_feat, dw_w, dw_b, pw_w, pw_b, eps=1e-5):
    C = local_feat.shape[1]
    mean = jnp.mean(local_feat, axis=(0, 2, 3), keepdims=True)
    var = jnp.var(local_feat, axis=(0, 2, 3), keepdims=True)
    normalized = (local_feat - mean) * lax.rsqrt(var + eps)

    h = lax.conv_general_dilated(
        global_feat, dw_w, window_strides=(1, 1), padding=((1, 1), (1, 1)),
        dimension_numbers=("NCHW", "OIHW", "NCHW"), feature_group_count=C,
        precision=lax.Precision.HIGHEST)
    h = h + dw_b.reshape(1, C, 1, 1)
    h = 0.5 * h * (1.0 + lax.erf(h * 0.7071067811865475))      # exact GELU
    gb = lax.conv_general_dilated(
        h, pw_w, window_strides=(1, 1), padding=((0, 0), (0, 0)),
        dimension_numbers=("NCHW", "OIHW", "NCHW"),
        precision=lax.Precision.HIGHEST)
    gb = gb + pw_b.reshape(1, 2 * C, 1, 1)
    gamma, beta = gb[:, :C], gb[:, C:]
    return normalized * (1 + gamma) + beta


if __name__ == "__main__":
    key = jax.random.PRNGKey(0)
    k1, k2, k3, k4, k5, k6 = jax.random.split(key, 6)
    N, C, H, W = 2, 4, 16, 16

    local_feat = jax.random.normal(k1, (N, C, H, W), dtype=jnp.float32)
    global_feat = jax.random.normal(k2, (N, C, H, W), dtype=jnp.float32)

    # Conv2d(dim, dim, 3, padding=1, groups=dim) parameters (torch init range).
    bnd_dw = 1.0 / math.sqrt(1 * 3 * 3)
    dw_w = jax.random.uniform(k3, (C, 1, 3, 3), jnp.float32, -bnd_dw, bnd_dw)
    dw_b = jax.random.uniform(k4, (C,), jnp.float32, -bnd_dw, bnd_dw)
    # Conv2d(dim, 2*dim, kernel_size=1) parameters.
    bnd_pw = 1.0 / math.sqrt(C)
    pw_w = jax.random.uniform(k5, (2 * C, C, 1, 1), jnp.float32, -bnd_pw, bnd_pw)
    pw_b = jax.random.uniform(k6, (2 * C,), jnp.float32, -bnd_pw, bnd_pw)

    out = spade_forward(local_feat, global_feat, dw_w, dw_b, pw_w, pw_b)
    out = jax.block_until_ready(out)

    ref = _reference_spade(local_feat, global_feat, dw_w, dw_b, pw_w, pw_b)

    assert out.shape == (N, C, H, W), out.shape
    if not jnp.allclose(out, ref, rtol=1e-4, atol=1e-4):
        err = float(jnp.max(jnp.abs(out - ref)))
        raise AssertionError(
            f"Pallas kernel mismatch vs JAX reference (max abs err {err})")
    print("KERNEL_OK")
</pallas_src>

<mosaic_0001>
module attributes {stable_mosaic.version = 11 : i64} {
  func.func @_bn_stats_kernel(%arg0: i32, %arg1: memref<1x8x256xf32, #tpu.memory_space<vmem>>, %arg2: memref<8x1xf32, #tpu.memory_space<vmem>>, %arg3: memref<8x1xf32, #tpu.memory_space<vmem>>) attributes {dimension_semantics = [#tpu.dimension_semantics<arbitrary>], iteration_bounds = array<i64: 1>, scalar_prefetch = 0 : i64, scratch_operands = 0 : i64, tpu.core_type = #tpu.core_type<tc>, window_params = [{transform_indices = @transform_0, window_bounds = array<i64: 1, 8, 256>}, {pipeline_mode = #tpu.pipeline_mode<synchronous>, transform_indices = @transform_1, window_bounds = array<i64: 8, 1>}, {pipeline_mode = #tpu.pipeline_mode<synchronous>, transform_indices = @transform_2, window_bounds = array<i64: 8, 1>}]} {
    %c0_i32 = arith.constant 0 : i32
    %0 = arith.cmpi eq, %arg0, %c0_i32 : i32
    %1 = arith.extui %0 : i1 to i32
    %c0_i32_0 = arith.constant 0 : i32
    %2 = arith.cmpi ne, %1, %c0_i32_0 : i32
    scf.if %2 {
      %cst_12 = arith.constant 0.000000e+00 : f32
      %16 = vector.broadcast %cst_12 : f32 to vector<8x1xf32>
      %c0_13 = arith.constant 0 : index
      %c0_14 = arith.constant 0 : index
      %17 = vector.load %arg2[%c0_13, %c0_14] : memref<8x1xf32, #tpu.memory_space<vmem>>, vector<8x1xf32>
      tpu.vector_store %arg2[%c0_13, %c0_14], %16 {strides = array<i32>} : memref<8x1xf32, #tpu.memory_space<vmem>>, vector<8x1xf32>,
      %cst_15 = arith.constant 0.000000e+00 : f32
      %18 = vector.broadcast %cst_15 : f32 to vector<8x1xf32>
      %c0_16 = arith.constant 0 : index
      %c0_17 = arith.constant 0 : index
      %19 = vector.load %arg3[%c0_16, %c0_17] : memref<8x1xf32, #tpu.memory_space<vmem>>, vector<8x1xf32>
      tpu.vector_store %arg3[%c0_16, %c0_17], %18 {strides = array<i32>} : memref<8x1xf32, #tpu.memory_space<vmem>>, vector<8x1xf32>,
    } else {
    }
    %c0 = arith.constant 0 : index
    %c0_1 = arith.constant 0 : index
    %c0_2 = arith.constant 0 : index
    %3 = vector.load %arg1[%c0, %c0_1, %c0_2] : memref<1x8x256xf32, #tpu.memory_space<vmem>>, vector<1x8x256xf32>
    %4 = vector.shape_cast %3 : vector<1x8x256xf32> to vector<8x256xf32>
    %c0_3 = arith.constant 0 : index
    %c0_4 = arith.constant 0 : index
    %5 = vector.load %arg2[%c0_3, %c0_4] : memref<8x1xf32, #tpu.memory_space<vmem>>, vector<8x1xf32>
    %cst = arith.constant dense<0.000000e+00> : vector<8xf32>
    %6 = vector.multi_reduction <add>, %4, %cst [1] : vector<8x256xf32> to vector<8xf32>
    %7 = vector.shape_cast %6 : vector<8xf32> to vector<8x1xf32>
    %8 = arith.addf %5, %7 : vector<8x1xf32>
    %c0_5 = arith.constant 0 : index
    %c0_6 = arith.constant 0 : index
    %9 = vector.load %arg2[%c0_5, %c0_6] : memref<8x1xf32, #tpu.memory_space<vmem>>, vector<8x1xf32>
    tpu.vector_store %arg2[%c0_5, %c0_6], %8 {strides = array<i32>} : memref<8x1xf32, #tpu.memory_space<vmem>>, vector<8x1xf32>,
    %c0_7 = arith.constant 0 : index
    %c0_8 = arith.constant 0 : index
    %10 = vector.load %arg3[%c0_7, %c0_8] : memref<8x1xf32, #tpu.memory_space<vmem>>, vector<8x1xf32>
    %11 = arith.mulf %4, %4 : vector<8x256xf32>
    %cst_9 = arith.constant dense<0.000000e+00> : vector<8xf32>
    %12 = vector.multi_reduction <add>, %11, %cst_9 [1] : vector<8x256xf32> to vector<8xf32>
    %13 = vector.shape_cast %12 : vector<8xf32> to vector<8x1xf32>
    %14 = arith.addf %10, %13 : vector<8x1xf32>
    %c0_10 = arith.constant 0 : index
    %c0_11 = arith.constant 0 : index
    %15 = vector.load %arg3[%c0_10, %c0_11] : memref<8x1xf32, #tpu.memory_space<vmem>>, vector<8x1xf32>
    tpu.vector_store %arg3[%c0_10, %c0_11], %14 {strides = array<i32>} : memref<8x1xf32, #tpu.memory_space<vmem>>, vector<8x1xf32>,
    return
  }
  func.func @transform_0(%arg0: i32) -> (i32, i32, i32) {
    %c0_i32 = arith.constant 0 : i32
    %c0_i32_0 = arith.constant 0 : i32
    %c0_i32_1 = arith.constant 0 : i32
    return %arg0, %c0_i32, %c0_i32_0 : i32, i32, i32
  }
  func.func @transform_1(%arg0: i32) -> (i32, i32) {
    %c0_i32 = arith.constant 0 : i32
    %c0_i32_0 = arith.constant 0 : i32
    %c0_i32_1 = arith.constant 0 : i32
    return %c0_i32, %c0_i32_0 : i32, i32
  }
  func.func @transform_2(%arg0: i32) -> (i32, i32) {
    %c0_i32 = arith.constant 0 : i32
    %c0_i32_0 = arith.constant 0 : i32
    %c0_i32_1 = arith.constant 0 : i32
    return %c0_i32, %c0_i32_0 : i32, i32
  }
}

</mosaic_0001>

<bundles_post_ra>
// kernel: tpu_custom_call.1
= control target key start
LH: loop header
LB: loop body
LE: loop exit
PB: predicated region body
PF: predicated region fallthrough
CT: control target
= control target key end

     0   :  { %8 = vsyncpa [#allocation3], 0  ;;  %s79_s9 = smov [#allocation2]   ;;  %s121_s0 = inlined_call_operand.hbm [shape: f32[1,8,256], index: 0, kind: input, shape index: {}]   ;;  %s122_s1 = inlined_call_operand.vmem [shape: f32[8,1], index: 1, kind: output, shape index: {0}]   ;;  %s123_s2 = inlined_call_operand.vmem [shape: f32[8,1], index: 2, kind: output, shape index: {1}]  }
   0x1   :  { %s15_s10 = sshll.u32 %s79_s9, 4  ;;  %s16_s10 = int_to_ptr.vmem [resolvable:$true] %s15_s10 }
   0x2   :  { %s65_s11 = scalar_lea.vmem %s16_s10, 256  ;;  %p70_p1 = scmp.lt.s32.totalorder %s16_s10, %s16_s10 }
   0x3   :  { %p66_p0 = scmp.ne.s32.totalorder %s16_s10, %s65_s11  ;;  %p71_p2 = scmp.lt.s32.totalorder %s65_s11, %s65_s11 }
   0x5   :  { %p72_p3 = por %p71_p2, %p70_p1 }
   0x7   :  { %p73_p4 = pnand %p72_p3, %p66_p0 }
   0x9   :  { %76 = shalt.err (!%p73_p4)
}
   0xa   :  { %18 = dma.hbm_to_vmem [thread:$0]  %s121_s0, 256, %s16_s10, [#allocation3]  }
   0xb   :  { %77 = dma.done.wait [#allocation3], 256  }
   0xc   :  { %78 = vsyncadd [#allocation3], 4294967040  ;;  %vm26_vm0 = vcmask 7168   ;;  %v80_v0 = vmov 0.0   ;;  %v29_v1 = vld [vmem:[#allocation2] sm:$0xff]  ;;  %v30_v2 = vld [vmem:[#allocation2 + $0x8] sm:$0xff] }
   0xd   :  { %27 = vst.msk [vmem:[%s122_s1] sm:$0xff] %vm26_vm0, %v80_v0  ;;  %28 = vst.msk [vmem:[%s123_s2] sm:$0xff] %vm26_vm0, %v80_v0  ;;  %v32_v3 = vadd.f32 %v30_v2, %v29_v1  ;;  %v39_v4 = vmul.f32 %v29_v1, %v29_v1  ;;  %v40_v5 = vmul.f32 %v30_v2, %v30_v2 }
   0xf   :  { %33 = vadd.xlane.f32.xlu0 %v32_v3  ;;  %v41_v6 = vadd.f32 %v40_v5, %v39_v4 }
  0x13   :  { %42 = vadd.xlane.f32.xlu0 %v41_v6 }
  0x14   :  { %v31_v7 = vld [vmem:[%s122_s1] sm:$0xff] }
  0x15   :  { %v38_v10 = vld [vmem:[%s123_s2] sm:$0xff] }
  0x98   :  { %v34_v8 = vpop.xlane.xlu0 %33 }
  0x99   :  { %v35_v9 = vadd.f32 %v34_v8, %v31_v7 }
  0x9b   :  { %37 = vst.msk [vmem:[%s122_s1] sm:$0xff] %vm26_vm0, %v35_v9 }
  0x9c   :  { %v43_v11 = vpop.xlane.xlu0 %42 }
  0x9d   :  { %v44_v12 = vadd.f32 %v43_v11, %v38_v10 }
  0x9f   :  { %45 = vst.msk [vmem:[%s123_s2] sm:$0xff] %vm26_vm0, %v44_v12 }
  0xa0   :  { %54 = vsyncpa [#allocation3], 1 }

</bundles_post_ra>
